<compile_context>
chip_gen: v7x
topology: tpu7x:2x2x1
jax: 0.10.0
libtpu: 0.0.40
codegen_flags: <defaults>
</compile_context>

<pallas_src>
import jax
import jax.numpy as jnp
from jax import lax
from jax.experimental import pallas as pl
from jax.experimental.pallas import tpu as pltpu


def _mamba_kernel(
    x_ref,       # (1, Ts, Dp)  bf16 input tile for one batch element
    w_in_ref,    # (Dp, 2Dp)    bf16 fused input-projection weight (transposed)
    b_in_ref,    # (1, 2Dp)     f32  fused input-projection bias
    w_out_ref,   # (Dp, Dp)     bf16 output weight (transposed)
    b_out_ref,   # (1, Dp)      f32  output bias
    ldec_ref,    # (Ts, Ts)     bf16 lower-triangular decay matrix L[t,k]=0.1*0.9^(t-k)
    dvec_ref,    # (Ts, 1)      f32  carry decay vector d[t]=0.9^(t+1)
    o_ref,       # (1, Ts, Dp)  f32  output tile
    h_carry,     # VMEM (1, Dp) f32  hidden-state carry, persists across the S axis
):
    s = pl.program_id(1)

    @pl.when(s == 0)
    def _():
        h_carry[...] = jnp.zeros_like(h_carry)

    ts = x_ref.shape[1]
    dp = x_ref.shape[2]

    x = x_ref[0]  # (Ts, Dp) bf16

    # Fused input projection: one bf16 MXU pass producing both halves,
    # accumulated in f32.
    proj = (
        jnp.dot(x, w_in_ref[...], preferred_element_type=jnp.float32)
        + b_in_ref[...]
    )  # (Ts, 2Dp) f32
    gate_pre = proj[:, :dp]
    hid_pre = proj[:, dp:]

    # sigmoid(gate) * silu(hidden) in f32 (v5e has no bf16 VPU/EUP).
    gated = jax.nn.sigmoid(gate_pre) * (hid_pre * jax.nn.sigmoid(hid_pre))  # (Ts, Dp)

    # Chunked recurrence on the MXU:
    #   h_t = 0.9^(t+1) * h_carry + sum_{k<=t} 0.1 * 0.9^(t-k) * gated_k
    hidden = (
        jnp.dot(ldec_ref[...], gated.astype(jnp.bfloat16),
                preferred_element_type=jnp.float32)
        + dvec_ref[...] * h_carry[...]
    )  # (Ts, Dp) f32

    # Carry the last hidden state into the next sequence tile.
    h_carry[...] = hidden[ts - 1:ts, :]

    # Output projection (bf16 MXU, f32 accumulate + bias).
    out = (
        jnp.dot(hidden.astype(jnp.bfloat16), w_out_ref[...],
                preferred_element_type=jnp.float32)
        + b_out_ref[...]
    )
    o_ref[0] = out.astype(o_ref.dtype)


def _round_up(n, m):
    return ((n + m - 1) // m) * m


def _choose_seq_tile(seq_len, d_pad, cap=512):
    """Lane-aligned sequence tile, bounded by `cap` and by ~2*Dp.

    The (Ts, Ts) decay matmul costs Ts^2*Dp FLOPs per tile vs 3*Ts*Dp^2 for the
    projections, so Ts is kept <= 2*Dp.  Never returns the full sequence; the
    caller pads S up to a multiple of Ts instead.
    """
    if seq_len <= 128:
        return _round_up(seq_len, 8)          # tiny sequences: sublane-aligned
    cap = max(128, min(cap, 2 * d_pad))
    cap = (cap // 128) * 128                   # lane-aligned cap
    if seq_len >= cap:
        return cap
    return _round_up(seq_len, 128)


def _vmem_estimate_bytes(ts, dp):
    bf16, f32 = 2, 4
    # Streamed tiles (double-buffered): x in bf16, out in f32.
    stream = 2 * ts * dp * bf16 + 2 * ts * dp * f32
    # Grid-invariant operands (single-buffered via pl.Buffered(1)).
    consts = (dp * 2 * dp + dp * dp + ts * ts) * bf16 + (2 * dp + dp + ts + dp) * f32
    # In-kernel temporaries at peak: proj (Ts,2Dp) f32, gated/hidden/out (Ts,Dp)
    # f32, plus bf16 copies of gated/hidden.
    interm = (2 * ts * dp + 3 * ts * dp) * f32 + 2 * ts * dp * bf16
    return stream + consts + interm


# Safe under v7x's 64 MiB physical VMEM (Mosaic internal scratch headroom
# included).  v5e/v6e have 128 MiB; raise this if you want Ts > 512 there.
_VMEM_CEILING = 48 << 20


def mamba_fallback(x, w_in, b_in, w_out, b_out, *, seq_tile_cap=512):
    """x: (B, S, D) f32.  w_in: (2D, D), b_in: (2D,), w_out: (D, D), b_out: (D,)."""
    B, S, D = x.shape
    out_dtype = x.dtype

    # --- Pad the model dim to a multiple of 128 for lane-dense stores and
    # lane-aligned gate/hidden slices.  Padded gate columns give sigmoid(0)=0.5
    # but padded hidden columns give silu(0)=0, so padded gated columns are
    # exactly 0 and never contaminate the recurrence or output projection.
    Dp = _round_up(D, 128)
    if Dp != D:
        pad = Dp - D
        w_in_full = jnp.concatenate(
            [jnp.pad(w_in[:D], ((0, pad), (0, pad))),
             jnp.pad(w_in[D:], ((0, pad), (0, pad)))], axis=0)        # (2Dp, Dp)
        b_in_full = jnp.concatenate(
            [jnp.pad(b_in[:D], (0, pad)), jnp.pad(b_in[D:], (0, pad))])  # (2Dp,)
        w_out_full = jnp.pad(w_out, ((0, pad), (0, pad)))              # (Dp, Dp)
        b_out_full = jnp.pad(b_out, (0, pad))                          # (Dp,)
        x = jnp.pad(x, ((0, 0), (0, 0), (0, pad)))
    else:
        w_in_full, b_in_full, w_out_full, b_out_full = w_in, b_in, w_out, b_out

    # --- Sequence tile: lane-aligned, bounded by D and the VMEM budget.
    Ts = _choose_seq_tile(S, Dp, seq_tile_cap)
    while Ts > 128 and Ts % 128 == 0 and \
            _vmem_estimate_bytes(Ts, Dp) > (_VMEM_CEILING * 3) // 4:
        Ts -= 128
    S_pad = _round_up(S, Ts)
    n_seq_tiles = S_pad // Ts

    # --- Operand prep: bf16 MXU operands, f32 biases, streamed x in bf16.
    w_in_t = jnp.transpose(w_in_full).astype(jnp.bfloat16)      # (Dp, 2Dp)
    b_in_2d = b_in_full.reshape(1, 2 * Dp).astype(jnp.float32)  # (1, 2Dp)
    w_out_t = jnp.transpose(w_out_full).astype(jnp.bfloat16)    # (Dp, Dp)
    b_out_2d = b_out_full.reshape(1, Dp).astype(jnp.float32)    # (1, Dp)

    x_bf16 = x.astype(jnp.bfloat16)
    if S_pad != S:
        x_bf16 = jnp.pad(x_bf16, ((0, 0), (0, S_pad - S), (0, 0)))

    # --- Constant decay operators for the chunked scan.
    t_idx = jnp.arange(Ts, dtype=jnp.int32)
    diff = t_idx[:, None] - t_idx[None, :]
    pow_ = jnp.power(jnp.float32(0.9), jnp.maximum(diff, 0).astype(jnp.float32))
    ldec = jnp.where(diff >= 0, 0.1 * pow_, 0.0).astype(jnp.bfloat16)        # (Ts, Ts)
    dvec = jnp.power(jnp.float32(0.9),
                     (t_idx + 1).astype(jnp.float32)).reshape(Ts, 1)         # (Ts, 1) f32

    vmem_est = _vmem_estimate_bytes(Ts, Dp)
    vmem_limit = int(min(max(int(1.25 * vmem_est), 16 << 20), _VMEM_CEILING))

    def _const_spec(shape):
        # Grid-invariant operand: single-buffered (double-buffering a constant
        # index_map is pure VMEM waste).
        return pl.BlockSpec(shape, lambda b, s: (0, 0), pipeline_mode=pl.Buffered(1))

    # TODO(synk): on v7x with per-chip B == 1 the "parallel" batch axis leaves
    # the second TensorCore idle; add a parallel D-tile axis (recurrence is
    # elementwise in D) or guarantee per-chip B >= 2 at the sharding level.
    out = pl.pallas_call(
        _mamba_kernel,
        out_shape=jax.ShapeDtypeStruct((B, S_pad, Dp), out_dtype),
        grid_spec=pltpu.PrefetchScalarGridSpec(
            num_scalar_prefetch=0,
            grid=(B, n_seq_tiles),
            in_specs=[
                pl.BlockSpec((1, Ts, Dp), lambda b, s: (b, s, 0)),   # x tile (streamed)
                _const_spec((Dp, 2 * Dp)),                           # fused W_in^T
                _const_spec((1, 2 * Dp)),                            # fused b_in
                _const_spec((Dp, Dp)),                               # W_out^T
                _const_spec((1, Dp)),                                # b_out
                _const_spec((Ts, Ts)),                               # decay matrix L
                _const_spec((Ts, 1)),                                # carry decay d
            ],
            out_specs=pl.BlockSpec((1, Ts, Dp), lambda b, s: (b, s, 0)),
            scratch_shapes=[
                pltpu.VMEM((1, Dp), jnp.float32),  # hidden-state carry
            ],
        ),
        compiler_params=pltpu.CompilerParams(
            dimension_semantics=("parallel", "arbitrary"),
            vmem_limit_bytes=vmem_limit,
        ),
    )(x_bf16, w_in_t, b_in_2d, w_out_t, b_out_2d, ldec, dvec)

    if S_pad != S or Dp != D:
        out = out[:, :S, :D]
    return out


def reference_forward(x, w_in, b_in, w_out, b_out):
    """Pure-JAX f32 reference mirroring the PyTorch fallback."""
    B, S, D = x.shape
    x_proj = jnp.einsum("bsd,ed->bse", x, w_in) + b_in
    x_gate, x_hidden = x_proj[..., :D], x_proj[..., D:]
    gated = jax.nn.sigmoid(x_gate) * jax.nn.silu(x_hidden)

    def step(h, g_t):
        h = 0.9 * h + 0.1 * g_t
        return h, h

    _, hs = lax.scan(step, jnp.zeros((B, D), x.dtype), jnp.swapaxes(gated, 0, 1))
    hidden = jnp.swapaxes(hs, 0, 1)  # (B, S, D)
    return jnp.einsum("bsd,ed->bse", hidden, w_out) + b_out


if __name__ == "__main__":
    B, S, D = 2, 8, 32

    key = jax.random.PRNGKey(0)
    kx, k1, k2, k3, k4 = jax.random.split(key, 5)

    # Deterministic parameter init (PyTorch Linear-style uniform bounds).
    bound_in = 1.0 / (D ** 0.5)
    w_in = jax.random.uniform(k1, (2 * D, D), jnp.float32, -bound_in, bound_in)
    b_in = jax.random.uniform(k2, (2 * D,), jnp.float32, -bound_in, bound_in)
    w_out = jax.random.uniform(k3, (D, D), jnp.float32, -bound_in, bound_in)
    b_out = jax.random.uniform(k4, (D,), jnp.float32, -bound_in, bound_in)

    x = jax.random.normal(kx, (B, S, D), jnp.float32)

    out = jax.block_until_ready(mamba_fallback(x, w_in, b_in, w_out, b_out))

    ref = reference_forward(x, w_in, b_in, w_out, b_out)
    assert out.shape == (B, S, D)
    # bf16 MXU operands vs f32 reference: expect ~1e-2 absolute deviation.
    assert jnp.allclose(out, ref, atol=5e-2, rtol=5e-2), "mismatch vs reference"

    print("KERNEL_OK")
</pallas_src>

<mosaic_0001>
module attributes {stable_mosaic.version = 11 : i64} {
  func.func @_mamba_kernel(%arg0: i32, %arg1: i32, %arg2: memref<1x8x128xbf16, #tpu.memory_space<vmem>>, %arg3: memref<128x256xbf16, #tpu.memory_space<vmem>>, %arg4: memref<1x256xf32, #tpu.memory_space<vmem>>, %arg5: memref<128x128xbf16, #tpu.memory_space<vmem>>, %arg6: memref<1x128xf32, #tpu.memory_space<vmem>>, %arg7: memref<8x8xbf16, #tpu.memory_space<vmem>>, %arg8: memref<8x1xf32, #tpu.memory_space<vmem>>, %arg9: memref<1x8x128xf32, #tpu.memory_space<vmem>>, %arg10: memref<1x128xf32, #tpu.memory_space<vmem>>) attributes {dimension_semantics = [#tpu.dimension_semantics<parallel>, #tpu.dimension_semantics<arbitrary>], iteration_bounds = array<i64: 2, 1>, scalar_prefetch = 0 : i64, scratch_operands = 1 : i64, tpu.core_type = #tpu.core_type<tc>, window_params = [{transform_indices = @transform_0, window_bounds = array<i64: 1, 8, 128>}, {pipeline_mode = #tpu.pipeline_mode<synchronous>, transform_indices = @transform_1, window_bounds = array<i64: 128, 256>}, {pipeline_mode = #tpu.pipeline_mode<synchronous>, transform_indices = @transform_2, window_bounds = array<i64: 1, 256>}, {pipeline_mode = #tpu.pipeline_mode<synchronous>, transform_indices = @transform_3, window_bounds = array<i64: 128, 128>}, {pipeline_mode = #tpu.pipeline_mode<synchronous>, transform_indices = @transform_4, window_bounds = array<i64: 1, 128>}, {pipeline_mode = #tpu.pipeline_mode<synchronous>, transform_indices = @transform_5, window_bounds = array<i64: 8, 8>}, {pipeline_mode = #tpu.pipeline_mode<synchronous>, transform_indices = @transform_6, window_bounds = array<i64: 8, 1>}, {transform_indices = @transform_7, window_bounds = array<i64: 1, 8, 128>}]} {
    %c0_i32 = arith.constant 0 : i32
    %0 = arith.cmpi eq, %arg1, %c0_i32 : i32
    %1 = arith.extui %0 : i1 to i32
    %c0_i32_0 = arith.constant 0 : i32
    %2 = arith.cmpi ne, %1, %c0_i32_0 : i32
    scf.if %2 {
      %cst_26 = arith.constant 0.000000e+00 : f32
      %44 = vector.broadcast %cst_26 : f32 to vector<1x128xf32>
      %c0_27 = arith.constant 0 : index
      %c0_28 = arith.constant 0 : index
      %45 = vector.load %arg10[%c0_27, %c0_28] : memref<1x128xf32, #tpu.memory_space<vmem>>, vector<1x128xf32>
      tpu.vector_store %arg10[%c0_27, %c0_28], %44 {strides = array<i32>} : memref<1x128xf32, #tpu.memory_space<vmem>>, vector<1x128xf32>,
    } else {
    }
    %c0 = arith.constant 0 : index
    %c0_1 = arith.constant 0 : index
    %c0_2 = arith.constant 0 : index
    %3 = vector.load %arg2[%c0, %c0_1, %c0_2] : memref<1x8x128xbf16, #tpu.memory_space<vmem>>, vector<1x8x128xbf16>
    %4 = vector.shape_cast %3 : vector<1x8x128xbf16> to vector<8x128xbf16>
    %c0_3 = arith.constant 0 : index
    %c0_4 = arith.constant 0 : index
    %5 = vector.load %arg3[%c0_3, %c0_4] : memref<128x256xbf16, #tpu.memory_space<vmem>>, vector<128x256xbf16>
    %cst = arith.constant dense<0.000000e+00> : vector<8x256xf32>
    %6 = tpu.matmul %4, %5, %cst {dimension_numbers = #tpu.dot_dimension_numbers<[1], [0], [0], [1], [0, 0, 1, 1], [], []>} : vector<8x128xbf16>, vector<128x256xbf16>, vector<8x256xf32> -> vector<8x256xf32>
    %c0_5 = arith.constant 0 : index
    %c0_6 = arith.constant 0 : index
    %7 = vector.load %arg4[%c0_5, %c0_6] : memref<1x256xf32, #tpu.memory_space<vmem>>, vector<1x256xf32>
    %8 = vector.broadcast %7 : vector<1x256xf32> to vector<8x256xf32>
    %9 = arith.addf %6, %8 : vector<8x256xf32>
    %10 = vector.extract_strided_slice %9 {offsets = [0, 0], sizes = [8, 128], strides = [1, 1]} : vector<8x256xf32> to vector<8x128xf32>
    %11 = vector.extract_strided_slice %9 {offsets = [0, 128], sizes = [8, 128], strides = [1, 1]} : vector<8x256xf32> to vector<8x128xf32>
    %12 = arith.negf %10 : vector<8x128xf32>
    %13 = math.exp %12 : vector<8x128xf32>
    %cst_7 = arith.constant 1.000000e+00 : f32
    %14 = vector.broadcast %cst_7 : f32 to vector<8x128xf32>
    %15 = arith.addf %14, %13 : vector<8x128xf32>
    %16 = arith.divf %14, %15 : vector<8x128xf32>
    %17 = arith.negf %11 : vector<8x128xf32>
    %18 = math.exp %17 : vector<8x128xf32>
    %cst_8 = arith.constant 1.000000e+00 : f32
    %19 = vector.broadcast %cst_8 : f32 to vector<8x128xf32>
    %20 = arith.addf %19, %18 : vector<8x128xf32>
    %21 = arith.divf %19, %20 : vector<8x128xf32>
    %22 = arith.mulf %11, %21 : vector<8x128xf32>
    %23 = arith.mulf %16, %22 : vector<8x128xf32>
    %c0_9 = arith.constant 0 : index
    %c0_10 = arith.constant 0 : index
    %24 = vector.load %arg7[%c0_9, %c0_10] : memref<8x8xbf16, #tpu.memory_space<vmem>>, vector<8x8xbf16>
    %25 = arith.truncf %23 : vector<8x128xf32> to vector<8x128xbf16>
    %cst_11 = arith.constant dense<0.000000e+00> : vector<8x128xf32>
    %26 = tpu.matmul %24, %25, %cst_11 {dimension_numbers = #tpu.dot_dimension_numbers<[1], [0], [0], [1], [0, 0, 1, 1], [], []>} : vector<8x8xbf16>, vector<8x128xbf16>, vector<8x128xf32> -> vector<8x128xf32>
    %c0_12 = arith.constant 0 : index
    %c0_13 = arith.constant 0 : index
    %27 = vector.load %arg8[%c0_12, %c0_13] : memref<8x1xf32, #tpu.memory_space<vmem>>, vector<8x1xf32>
    %c0_14 = arith.constant 0 : index
    %c0_15 = arith.constant 0 : index
    %28 = vector.load %arg10[%c0_14, %c0_15] : memref<1x128xf32, #tpu.memory_space<vmem>>, vector<1x128xf32>
    %29 = vector.broadcast %27 : vector<8x1xf32> to vector<8x128xf32>
    %30 = vector.broadcast %28 : vector<1x128xf32> to vector<8x128xf32>
    %31 = arith.mulf %29, %30 : vector<8x128xf32>
    %32 = arith.addf %26, %31 : vector<8x128xf32>
    %33 = vector.extract_strided_slice %32 {offsets = [7, 0], sizes = [1, 128], strides = [1, 1]} : vector<8x128xf32> to vector<1x128xf32>
    %c0_16 = arith.constant 0 : index
    %c0_17 = arith.constant 0 : index
    %34 = vector.load %arg10[%c0_16, %c0_17] : memref<1x128xf32, #tpu.memory_space<vmem>>, vector<1x128xf32>
    tpu.vector_store %arg10[%c0_16, %c0_17], %33 {strides = array<i32>} : memref<1x128xf32, #tpu.memory_space<vmem>>, vector<1x128xf32>,
    %35 = arith.truncf %32 : vector<8x128xf32> to vector<8x128xbf16>
    %c0_18 = arith.constant 0 : index
    %c0_19 = arith.constant 0 : index
    %36 = vector.load %arg5[%c0_18, %c0_19] : memref<128x128xbf16, #tpu.memory_space<vmem>>, vector<128x128xbf16>
    %cst_20 = arith.constant dense<0.000000e+00> : vector<8x128xf32>
    %37 = tpu.matmul %35, %36, %cst_20 {dimension_numbers = #tpu.dot_dimension_numbers<[1], [0], [0], [1], [0, 0, 1, 1], [], []>} : vector<8x128xbf16>, vector<128x128xbf16>, vector<8x128xf32> -> vector<8x128xf32>
    %c0_21 = arith.constant 0 : index
    %c0_22 = arith.constant 0 : index
    %38 = vector.load %arg6[%c0_21, %c0_22] : memref<1x128xf32, #tpu.memory_space<vmem>>, vector<1x128xf32>
    %39 = vector.broadcast %38 : vector<1x128xf32> to vector<8x128xf32>
    %40 = arith.addf %37, %39 : vector<8x128xf32>
    %c0_23 = arith.constant 0 : index
    %c0_24 = arith.constant 0 : index
    %c0_25 = arith.constant 0 : index
    %41 = vector.load %arg9[%c0_23, %c0_24, %c0_25] : memref<1x8x128xf32, #tpu.memory_space<vmem>>, vector<1x8x128xf32>
    %42 = vector.shape_cast %41 : vector<1x8x128xf32> to vector<8x128xf32>
    %43 = vector.shape_cast %40 : vector<8x128xf32> to vector<1x8x128xf32>
    tpu.vector_store %arg9[%c0_23, %c0_24, %c0_25], %43 {strides = array<i32>} : memref<1x8x128xf32, #tpu.memory_space<vmem>>, vector<1x8x128xf32>,
    return
  }
  func.func @transform_0(%arg0: i32, %arg1: i32) -> (i32, i32, i32) {
    %c0_i32 = arith.constant 0 : i32
    %c0_i32_0 = arith.constant 0 : i32
    return %arg0, %arg1, %c0_i32 : i32, i32, i32
  }
  func.func @transform_1(%arg0: i32, %arg1: i32) -> (i32, i32) {
    %c0_i32 = arith.constant 0 : i32
    %c0_i32_0 = arith.constant 0 : i32
    %c0_i32_1 = arith.constant 0 : i32
    return %c0_i32, %c0_i32_0 : i32, i32
  }
  func.func @transform_2(%arg0: i32, %arg1: i32) -> (i32, i32) {
    %c0_i32 = arith.constant 0 : i32
    %c0_i32_0 = arith.constant 0 : i32
    %c0_i32_1 = arith.constant 0 : i32
    return %c0_i32, %c0_i32_0 : i32, i32
  }
  func.func @transform_3(%arg0: i32, %arg1: i32) -> (i32, i32) {
    %c0_i32 = arith.constant 0 : i32
    %c0_i32_0 = arith.constant 0 : i32
    %c0_i32_1 = arith.constant 0 : i32
    return %c0_i32, %c0_i32_0 : i32, i32
  }
  func.func @transform_4(%arg0: i32, %arg1: i32) -> (i32, i32) {
    %c0_i32 = arith.constant 0 : i32
    %c0_i32_0 = arith.constant 0 : i32
    %c0_i32_1 = arith.constant 0 : i32
    return %c0_i32, %c0_i32_0 : i32, i32
  }
  func.func @transform_5(%arg0: i32, %arg1: i32) -> (i32, i32) {
    %c0_i32 = arith.constant 0 : i32
    %c0_i32_0 = arith.constant 0 : i32
    %c0_i32_1 = arith.constant 0 : i32
    return %c0_i32, %c0_i32_0 : i32, i32
  }
  func.func @transform_6(%arg0: i32, %arg1: i32) -> (i32, i32) {
    %c0_i32 = arith.constant 0 : i32
    %c0_i32_0 = arith.constant 0 : i32
    %c0_i32_1 = arith.constant 0 : i32
    return %c0_i32, %c0_i32_0 : i32, i32
  }
  func.func @transform_7(%arg0: i32, %arg1: i32) -> (i32, i32, i32) {
    %c0_i32 = arith.constant 0 : i32
    %c0_i32_0 = arith.constant 0 : i32
    return %arg0, %arg1, %c0_i32 : i32, i32, i32
  }
}

</mosaic_0001>

<bundles_post_ra>
// kernel: tpu_custom_call.1
= control target key start
LH: loop header
LB: loop body
LE: loop exit
PB: predicated region body
PF: predicated region fallthrough
CT: control target
= control target key end

     0   :  { %12 = vsyncpa [#allocation4], 0  ;;  %s1385_s0 = inlined_call_operand.vmem [shape: bf16[2,8,128], index: 0, kind: input, shape index: {}]   ;;  %s1386_s1 = inlined_call_operand.hbm [shape: bf16[128,256], index: 1, kind: input, shape index: {}]   ;;  %s1387_s2 = inlined_call_operand.vmem [shape: f32[1,256], index: 2, kind: input, shape index: {}]   ;;  %s1388_s3 = inlined_call_operand.hbm [shape: bf16[128,128], index: 3, kind: input, shape index: {}]   ;;  %s1389_s4 = inlined_call_operand.vmem [shape: f32[1,128], index: 4, kind: input, shape index: {}]   ;;  %s1390_s5 = inlined_call_operand.vmem [shape: bf16[8,8], index: 5, kind: input, shape index: {}]   ;;  %s1391_s6 = inlined_call_operand.vmem [shape: f32[8,1], index: 6, kind: input, shape index: {}]   ;;  %s1392_s7 = inlined_call_operand.hbm [shape: f32[2,8,128], index: 7, kind: output, shape index: {}]  }
   0x1   :  { %13 = vsyncpa [#allocation7], 0 }
   0x2   :  { %14 = vsyncpa [#allocation5], 0 }
   0x3   :  { %16 = vsyncpa [#allocation5 + $0x1], 0  ;;  %s1184_s24 = smov 0   ;;  %s1186_s25 = smov 0  }
   0x4   :  { %s1188_s26 = smov 0   ;;  %s1190_s27 = smov 0  }
   0x5   :  { %s1192_s28 = smov 0   ;;  %s1194_s29 = smov 0  }
   0x6 LB: > { %1399 = sst [smem:[#allocation12_spill]] %s1128_s28  ;;  %s785_s30 = sadd.s32 4294967295, %s1132_s29   ;;  %s1132_s29 = sphi %s1194_s29, %s22_s29   ;;  %s1128_s28 = sphi %s1192_s28, %s1413_s28   ;;  %s1124_s27 = sphi %s1190_s27, %s1412_s27   ;;  %s1120_s26 = sphi %s1188_s26, %s1416_s26   ;;  %s1116_s25 = sphi %s1186_s25, %s1415_s25   ;;  %s1112_s24 = sphi %s1184_s24, %s1414_s24  }
   0x7   : > { %s786_s8 = sadd.s32 4294967294, %s1132_s29   ;;  %s34_s9 = sadd.s32 1, %s1128_s28 }
   0x8   : > { %s197_s10 = sadd.s32 1, %s1120_s26  ;;  %p36_p0 = scmp.ge.s32.totalorder %s34_s9, 2 }
   0x9   : > { %p207_p1 = scmp.ne.s32.totalorder %s1120_s26, %s1116_s25  ;;  %p208_p2 = scmp.eq.s32.totalorder %s785_s30, 1 }
   0xa   : > { %p213_p3 = scmp.ne.s32.totalorder %s1116_s25, %s1112_s24  ;;  %s1418_s9 = smov (%p36_p0, %s34_s9), 0 }
   0xb   : > { %1400 = sst [smem:[#allocation13_spill]] %s1418_s9  ;;  %p1224_p4 = por %p208_p2, %p207_p1 }
   0xc   : > { %p214_p5 = scmp.eq.s32.totalorder %s786_s8, 1  ;;  %s192_s12 = ssub.s32 %s1128_s28, %s1418_s9 }
   0xd   : > { %s1401_s11 = scalar_select %p1224_p4, 1, 0 }
   0xe   : > { %p787_p6 = scmp.ge.s32.totalorder %s1132_s29, 1  ;;  %p195_p7 = scmp.eq.s32.totalorder %s192_s12, 0 }
   0xf   : > { %p1231_p8 = por %p214_p5, %p213_p3  ;;  %p221_p9 = scmp.lt.s32.totalorder %s1132_s29, 3 }
  0x10   : > { %s1237_s14 = scalar_select %p195_p7, %s1120_s26, %s197_s10  }
  0x11   : > { %s1402_s13 = scalar_select %p1231_p8, 1, 0 }
  0x12   : > { %1403 = sst [smem:[#allocation14_spill]] %s1237_s14  ;;  %p1239_p10 = pnand %p787_p6, %p221_p9 }
  0x13   : > { %p1243_p11 = scmp.eq.s32.totalorder %s785_s30, 0  ;;  %s1134_s17 = smov [#allocation3]  }
  0x14   : > { %s1404_s15 = scalar_select %p1239_p10, 1, 0 }
  0x15   : > { %s1405_s16 = scalar_select %p1243_p11, 1, 0 }
  0x16   : > { %p876_p12 = pneg %p1239_p10  ;;  %s233_s18 = sshll.u32 %s1134_s17, 4  ;;  %s234_s18 = int_to_ptr.vmem [resolvable:$true] %s233_s18 }
  0x17   : > { %s1135_s20 = smov [#allocation6]   ;;  %s990_s30 = scalar_lea.hbm %s1386_s1, 2048 }
  0x18   : > { %p1251_p13 = pnand %p1243_p11, %p876_p12  ;;  %s249_s21 = sshll.u32 %s1135_s20, 4  ;;  %s1255_s21 = int_to_ptr.vmem [resolvable:$true] %s249_s21 }
  0x19   : > { %p991_p0 = scmp.ne.s32.totalorder %s1386_s1, %s990_s30  ;;  %p997_p5 = scmp.lt.u32.totalorder %s990_s30, %s1386_s1 }
  0x1a   : > { %p992_p1 = pneg %p1251_p13 }
  0x1c   : > { %p993_p2 = pnand %p992_p1, %p991_p0 }
  0x1e   : > { %p994_p3 = pneg %p993_p2 }
  0x20   : > { %p999_p6 = pnand %p997_p5, %p994_p3 }
  0x22   : > { %1002 = shalt.err (!%p999_p6)
}
  0x23   : > { %s1003_s20 = scalar_lea.vmem %s234_s18, 2048  ;;  %p1011_p8 = scmp.lt.s32.totalorder %s234_s18, %s234_s18 }
  0x24   : > { %p1004_p7 = scmp.ne.s32.totalorder %s234_s18, %s1003_s20  ;;  %p1012_p4 = scmp.lt.s32.totalorder %s1003_s20, %s1003_s20 }
  0x26   : > { %p1006_p9 = pnand %p1004_p7, %p992_p1  ;;  %p1013_p11 = por %p1012_p4, %p1011_p8 }
  0x28   : > { %p1007_p12 = pneg %p1006_p9 }
  0x2a   : > { %p1014_p10 = pnand %p1013_p11, %p1007_p12 }
  0x2c   : > { %1017 = shalt.err (!%p1014_p10)
}
  0x2d   : > { %s1136_s22 = smov 128   ;;  %s1137_s23 = smov 8  }
  0x2e   : > { %879 = dma.hbm_to_vmem [thread:$0]  (!%p1251_p13), %s1386_s1, 2048, %s234_s18, [#allocation4], %s1136_s22, %s1136_s22, %s1137_s23  }
  0x2f   : > { %s1018_s17 = scalar_lea.hbm %s1388_s3, 1024 }
  0x30   : > { %p1019_p0 = scmp.ne.s32.totalorder %s1388_s3, %s1018_s17  ;;  %p1025_p10 = scmp.lt.u32.totalorder %s1018_s17, %s1388_s3 }
  0x32   : > { %p1021_p4 = pnand %p1019_p0, %p992_p1 }
  0x34   : > { %p1022_p8 = pneg %p1021_p4 }
  0x36   : > { %p1027_p11 = pnand %p1025_p10, %p1022_p8 }
  0x38   : > { %1030 = shalt.err (!%p1027_p11)
}
  0x39   : > { %s1031_s18 = scalar_lea.vmem %s1255_s21, 1024  ;;  %p1039_p6 = scmp.lt.s32.totalorder %s1255_s21, %s1255_s21 }
  0x3a   : > { %p1032_p2 = scmp.ne.s32.totalorder %s1255_s21, %s1031_s18  ;;  %p1040_p7 = scmp.lt.s32.totalorder %s1031_s18, %s1031_s18 }
  0x3c   : > { %p1034_p3 = pnand %p1032_p2, %p992_p1  ;;  %p1041_p9 = por %p1040_p7, %p1039_p6 }
  0x3e   : > { %p1035_p5 = pneg %p1034_p3 }
  0x40   : > { %p1042_p12 = pnand %p1041_p9, %p1035_p5 }
  0x42   : > { %1045 = shalt.err (!%p1042_p12)
}
  0x43   : > { %s1138_s28 = smov 64   ;;  %s1139_s9 = smov 4  }
  0x44   : > { %882 = dma.hbm_to_vmem [thread:$0]  (!%p1251_p13), %s1388_s3, 1024, %s1255_s21, [#allocation7], %s1138_s28, %s1138_s28, %s1139_s9  }
  0x45   : > { %p1407_p0 = scmp.ne.s32.totalorder %s1404_s15, 0 }
  0x46   : > { %p1408_p1 = scmp.ne.s32.totalorder (!%p1407_p0), %s1405_s16, 0 }
  0x47   : > { %284 = sbr.rel (%p1407_p0) target bundleno = 810 (0x32a), region = 48 }
  0x4e   : > { %1099 = dma.done.wait (%p1408_p1), [#allocation4], 2048  }
  0x4f   : > { %1101 = vsyncadd (%p1408_p1), [#allocation4], 4294965248 }
  0x50   : > { %1103 = dma.done.wait (%p1408_p1), [#allocation7], 1024  }
  0x51   : > { %1105 = vsyncadd (%p1408_p1), [#allocation7], 4294966272  ;;  %v1140_v0 = vmov 0   ;;  %v950_v1 = vld [vmem:[#allocation3 + $0x4] ss:$8 sps:$4 sm:$0xff]   ;;  %p322_p13 = scmp.lt.s32.totalorder %s1124_s27, 1  ;;  %v354_v20 = vlaneseq }
  0x52   : > { %476 = vmatprep.mubr.bf16.mxu0 %v1140_v0  ;;  %949 = vset.pattern.permute.xlu0 %v1140_v0  ;;  %v952_v2 = vld [vmem:[#allocation3] ss:$8 sps:$4 sm:$0xff]   ;;  %v953_v3 = vld [vmem:[#allocation3 + $0x14] ss:$8 sps:$4 sm:$0xff]   ;;  %v955_v4 = vld [vmem:[#allocation3 + $0x10] ss:$8 sps:$4 sm:$0xff]  }
  0x53   : > { %444 = vmatprep.subr.bf16.mxu0 %v950_v1  ;;  %v956_v5 = vld [vmem:[#allocation3 + $0x24] ss:$8 sps:$4 sm:$0xff]   ;;  %v958_v6 = vld [vmem:[#allocation3 + $0x20] ss:$8 sps:$4 sm:$0xff]   ;;  %v959_v7 = vld [vmem:[#allocation3 + $0x34] ss:$8 sps:$4 sm:$0xff]  }
  0x54   : > { %445 = vmatpush1.bf16.msra.mxu0 %v952_v2  ;;  %v961_v8 = vld [vmem:[#allocation3 + $0x30] ss:$8 sps:$4 sm:$0xff]   ;;  %v962_v9 = vld [vmem:[#allocation3 + $0x44] ss:$8 sps:$4 sm:$0xff]   ;;  %v964_v10 = vld [vmem:[#allocation3 + $0x40] ss:$8 sps:$4 sm:$0xff]  }
  0x55   : > { %446 = vmatprep.subr.bf16.mxu0 %v953_v3  ;;  %v965_v11 = vld [vmem:[#allocation3 + $0x54] ss:$8 sps:$4 sm:$0xff]   ;;  %v967_v12 = vld [vmem:[#allocation3 + $0x50] ss:$8 sps:$4 sm:$0xff]   ;;  %v968_v13 = vld [vmem:[#allocation3 + $0x64] ss:$8 sps:$4 sm:$0xff]  }
  0x56   : > { %s323_s15 = scalar_select %p322_p13, %s1124_s27, 1  ;;  %v970_v14 = vld [vmem:[#allocation3 + $0x60] ss:$8 sps:$4 sm:$0xff]   ;;  %v971_v15 = vld [vmem:[#allocation3 + $0x74] ss:$8 sps:$4 sm:$0xff]   ;;  %v1141_v18 = vmov 0.0  }
  0x57   : > { %v973_v16 = vld [vmem:[#allocation3 + $0x70] ss:$8 sps:$4 sm:$0xff]   ;;  %840 = vmatprep.subr.bf16.mxu1 %v1141_v18  ;;  %334 = vst [vmem:[#allocation2] sm:$0x1] %v1141_v18  ;;  %vm1142_vm0 = vmmov 0   ;;  %v501_v19 = vld [vmem:[%s1391_s6] sm:$0xff] }
  0x58   : > { %447 = vmatpush1.bf16.msra.mxu0 %v955_v4  ;;  %s795_s16 = sshll.u32 %s323_s15, 2  ;;  %842 = vmatprep.mubr.msk.bf16.mxu1 %vm1142_vm0, %v1141_v18  ;;  %v355_v21 = vshrl.u32 %v354_v20, 7  ;;  %v352_v23 = vld [vmem:[%s1387_s2] sm:$0x3]  ;;  %vm519_vm1 = vcmask 1043456   ;;  %vm515_vm2 = vcmask 64512  }
  0x59   : > { %448 = vmatprep.subr.bf16.mxu0 %v956_v5  ;;  %s328_s23 = scalar_lea.vmem %s1385_s0, %s795_s16  ;;  %505 = vperm.xlu0 %949, %v501_v19   ;;  %v499_v45 = vld [vmem:[%s1390_s5] sm:$0xf]  ;;  %v975_v47 = vld [vmem:[#allocation6 + $0x8] sm:$0xff]   ;;  %v976_v48 = vld [vmem:[#allocation6 + $0x10] sm:$0xff]   ;;  %s319_s18 = sand.u32 1, %s1116_s25  }
  0x5a   : > { %v335_v17 = vld [vmem:[%s328_s23] sm:$0xf]  ;;  %v356_v22 = vsub.s32 0, %v355_v21  ;;  %v360_v24 = vsub.s32 1, %v355_v21  ;;  %v979_v51 = vld [vmem:[#allocation6 + $0x28] sm:$0xff]   ;;  %v980_v52 = vld [vmem:[#allocation6 + $0x30] sm:$0xff]  }
  0x5b   : > { %v974_v46 = vld [vmem:[#allocation6] sm:$0xff]   ;;  %v977_v49 = vld [vmem:[#allocation6 + $0x18] sm:$0xff]   ;;  %s794_s28 = sshll.u32 %s319_s18, 3  ;;  %s826_s22 = sshll.u32 %s1124_s27, 7 }
  0x5c   : > { %449 = vmatpush1.bf16.msra.mxu0 %v958_v6  ;;  %v357_v25 = vrot.slane %v352_v23, %v356_v22  ;;  %v361_v26 = vrot.slane %v352_v23, %v360_v24  ;;  %v978_v50 = vld [vmem:[#allocation6 + $0x20] sm:$0xff]   ;;  %v981_v53 = vld [vmem:[#allocation6 + $0x38] sm:$0xff]   ;;  %s321_s15 = scalar_lea.vmem [#allocation8], %s794_s28  ;;  %s1338_s23 = scalar_lea.hbm %s1392_s7, %s826_s22 }
  0x5d   : > { %450 = vmatprep.subr.bf16.mxu0 %v959_v7  ;;  %v816_v63 = vld [vmem:[%s1389_s4] ss:$0 sm:$0xff]  ;;  %s692_s16 = sshll.u32 %s321_s15, 4  ;;  %s678_s30 = scalar_lea.sflag [#allocation5], %s319_s18  ;;  %s1340_s16 = int_to_ptr.vmem [resolvable:$true] %s692_s16 }
  0x5e   : > { %v814_v55 = vld [vmem:[#allocation2] ss:$0 sm:$0xff]  ;;  %s1046_s27 = scalar_lea.vmem %s1340_s16, 128  ;;  %p1409_p8 = scmp.ne.s32.totalorder %s1401_s11, 0 }
  0x5f   : > { %p1047_p4 = scmp.ne.s32.totalorder %s1340_s16, %s1046_s27  ;;  %s1143_s8 = smov [#allocation8]  }
  0x60   : > { %451 = vmatpush1.bf16.msra.mxu0 %v961_v8  ;;  %s1050_s10 = sshll.u32 %s1143_s8, 4  ;;  %s1051_s10 = int_to_ptr.vmem [resolvable:$false] %s1050_s10 }
  0x61   : > { %452 = vmatprep.subr.bf16.mxu0 %v962_v9  ;;  %p1048_p10 = pnand %p1047_p4, %p1409_p8  ;;  %s1052_s12 = scalar_lea.vmem %s1051_s10, 256 }
  0x62   : > { %p1053_p2 = scmp.lt.s32.totalorder %s1340_s16, %s1051_s10  ;;  %p1054_p3 = scmp.lt.s32.totalorder %s1052_s12, %s1046_s27 }
  0x63   : > { %p1049_p11 = pneg %p1048_p10 }
  0x64   : > { %453 = vmatpush1.bf16.msra.mxu0 %v964_v10  ;;  %p1055_p5 = por %p1054_p3, %p1053_p2 }
  0x65   : > { %454 = vmatprep.subr.bf16.mxu0 %v965_v11 }
  0x66   : > { %p1056_p6 = pnand %p1055_p5, %p1049_p11 }
  0x68   : > { %455 = vmatpush1.bf16.msra.mxu0 %v967_v12 }
  0x69   : > { %456 = vmatprep.subr.bf16.mxu0 %v968_v13 }
  0x6c   : > { %457 = vmatpush1.bf16.msra.mxu0 %v970_v14 }
  0x6d   : > { %458 = vmatprep.subr.bf16.mxu0 %v971_v15 }
  0x70   : > { %459 = vmatpush1.bf16.msra.mxu0 %v973_v16 }
  0x73   : > { %477 = vmatmul.mubr.bf16.vlgmr.msra.gmra.mrb[0].mxu0 %v335_v17 }
  0xd8   : > { %v506_v54 = vpop.permute.xlu0 %505 }
  0xd9   : > { %v514_v56 = vmul.f32 %v814_v55, %v506_v54 }
 0x146   : > { %v478_v27 = vpop.f32.mrb[0].mxu0 }
 0x147   : > { %v479_v28 = vadd.f32 %v478_v27, %v357_v25  ;;  %v480_v29 = vpop.f32.mrb[1].mxu0 }
 0x148   : > { %v481_v30 = vadd.f32 %v480_v29, %v361_v26  ;;  %v482_v31 = vpop.f32.mrb[2].mxu0 }
 0x149   : > { %v812_v32 = vmul.f32 -1.442695, %v479_v28  ;;  %v483_v33 = vpop.f32.mrb[3].mxu0 }
 0x14a   : > { %v813_v34 = vmul.f32 -1.442695, %v481_v30 }
 0x14b   : > { %982 = vpow2.f32 %v812_v32 }
 0x14c   : > { %984 = vpow2.f32 %v813_v34 }
 0x155   : > { %v983_v35 = vpop.eup %982 }
 0x156   : > { %v985_v36 = vpop.eup %984  ;;  %v488_v37 = vadd.f32 1.0, %v983_v35 }
 0x157   : > { %v494_v38 = vadd.f32 1.0, %v985_v36 }
 0x159   : > { %986 = vrcp.f32 %v494_v38 }
 0x15a   : > { %988 = vrcp.f32 %v488_v37 }
 0x163   : > { %v987_v39 = vpop.eup %986 }
 0x164   : > { %v497_v40 = vmul.f32 %v987_v39, %v481_v30  ;;  %v989_v41 = vpop.eup %988 }
 0x166   : > { %v498_v42 = vmul.f32 %v989_v41, %v497_v40 }
 0x168   : > { %v500_v43 = vpack.c.bf16 %v498_v42, %v498_v42 }
 0x16a   : > { %v521_v44 = vsel %vm519_vm1, %v500_v43, 0 }
 0x16b   : > { %841 = vmatpush3.bf16.msra.mxu1 %v521_v44 }
 0x16c   : > { %846 = vmatprep.subr.bf16.mxu1 %v1141_v18 }
 0x16e   : > { %843 = vmatmul.mubr.msk.bf16.vlgmr.msra.gmra.mrb[0].mxu1 %vm515_vm2, %v499_v45 }
 0x16f   : > { %847 = vmatpush3.bf16.msra.mxu1 %v974_v46  ;;  %862 = vmatprep.mubr.msk.bf16.mxu1 %vm1142_vm0, %v1141_v18 }
 0x170   : > { %848 = vmatprep.subr.bf16.mxu1 %v1141_v18 }
 0x173   : > { %849 = vmatpush3.bf16.msra.mxu1 %v975_v47 }
 0x174   : > { %850 = vmatprep.subr.bf16.mxu1 %v1141_v18 }
 0x177   : > { %851 = vmatpush3.bf16.msra.mxu1 %v976_v48 }
 0x178   : > { %852 = vmatprep.subr.bf16.mxu1 %v1141_v18 }
 0x17b   : > { %853 = vmatpush3.bf16.msra.mxu1 %v977_v49 }
 0x17c   : > { %854 = vmatprep.subr.bf16.mxu1 %v1141_v18 }
 0x17f   : > { %855 = vmatpush3.bf16.msra.mxu1 %v978_v50 }
 0x180   : > { %856 = vmatprep.subr.bf16.mxu1 %v1141_v18 }
 0x183   : > { %857 = vmatpush3.bf16.msra.mxu1 %v979_v51 }
 0x184   : > { %858 = vmatprep.subr.bf16.mxu1 %v1141_v18 }
 0x187   : > { %859 = vmatpush3.bf16.msra.mxu1 %v980_v52 }
 0x188   : > { %860 = vmatprep.subr.bf16.mxu1 %v1141_v18 }
 0x18b   : > { %861 = vmatpush3.bf16.msra.mxu1 %v981_v53 }
 0x241   : > { %v557_v57 = vpop.f32.mrb[0].mxu1 }
 0x242   : > { %v558_v58 = vadd.f32 %v557_v57, %v514_v56  ;;  %v844_v59 = vpop.f32.mrb[1].mxu1 }
 0x243   : > { %v560_v60 = vpop.f32.mrb[2].mxu1 }
 0x244   : > { %563 = vst [vmem:[#allocation2 - $0x7] sm:$0x80] %v558_v58  ;;  %v564_v61 = vpack.c.bf16 %v558_v58, %v558_v58  ;;  %v845_v62 = vpop.f32.mrb[3].mxu1 }
 0x246   : > { %863 = vmatmul.mubr.bf16.vlgmr.msra.gmra.mrb[4].mxu1 %v564_v61 }
 0x319   : > { %v670_v0 = vpop.f32.mrb[4].mxu1 }
 0x31a   : > { %v671_v1 = vadd.f32 %v816_v63, %v670_v0  ;;  %v864_v2 = vpop.f32.mrb[5].mxu1 }
 0x31b   : > { %v673_v3 = vpop.f32.mrb[6].mxu1 }
 0x31c   : > { %676 = vst [vmem:[%s321_s15] sm:$0xff] %v671_v1  ;;  %v865_v4 = vpop.f32.mrb[7].mxu1 }
 0x31d   : > { %1059 = shalt.err (!%p1056_p6)
}
 0x31e   : > { %s1060_s17 = scalar_lea.hbm %s1338_s23, 128  ;;  %s1064_s28 = scalar_lea.hbm %s1392_s7, 256 }
 0x31f   : > { %p1061_p7 = scmp.ne.s32.totalorder %s1338_s23, %s1060_s17  ;;  %p1065_p0 = scmp.lt.u32.totalorder %s1338_s23, %s1392_s7 }
 0x320   : > { %p1066_p1 = scmp.lt.u32.totalorder %s1064_s28, %s1060_s17  ;;  %p1068_p4 = scmp.lt.u32.totalorder %s1060_s17, %s1338_s23 }
 0x321   : > { %p1062_p9 = pnand %p1061_p7, %p1409_p8 }
 0x322   : > { %p1067_p13 = por %p1066_p1, %p1065_p0 }
 0x323   : > { %p1063_p12 = pneg %p1062_p9 }
 0x324   : > { %p1069_p10 = por %p1068_p4, %p1067_p13 }
 0x326   : > { %p1070_p11 = pnand %p1069_p10, %p1063_p12 }
 0x328   : > { %1073 = shalt.err (!%p1070_p11)
}
 0x329   : > { %874 = dma.vmem_to_hbm [thread:$0]  (%p1409_p8), %s1340_s16, 128, %s1338_s23, %s678_s30  }
 0x32a PF: > { %p891_p2 = scmp.ge.s32.totalorder %s1132_s29, 2  ;;  %s704_s22 = sand.u32 1, %s1112_s24  }
 0x32b   : > { %p1410_p3 = scmp.ne.s32.totalorder %s1402_s13, 0  ;;  %s705_s15 = scalar_lea.sflag [#allocation5], %s704_s22 }
 0x32d   : > { %p884_p5 = pnand %p891_p2, %p1410_p3 }
 0x32f   : > { %1107 = dma.done.wait (!%p884_p5), %s705_s15, 128  }
 0x330   : > { %1109 = vsyncadd (!%p884_p5), %s705_s15, 4294967168  ;;  %s22_s29 = sadd.s32 1, %s1132_s29   ;;  %s1411_s11 = sld [smem:[#allocation14_spill]] }
 0x331   : > { %p19_p6 = scmp.ge.s32.totalorder %s22_s29, 4   ;;  %s1412_s27 = sld [smem:[#allocation12_spill]] }
 0x332   : > { %s1413_s28 = sld [smem:[#allocation13_spill]]  ;;  %s1414_s24 = smov %s1116_s25 }
 0x333   : > { %s1415_s25 = smov %s1120_s26  ;;  %21 = sbr.rel (!%p19_p6) target bundleno = 6 (0x6), region = 96 }
 0x336   : > { %s1416_s26 = smov %s1411_s11 }
 0x33a   :  { %710 = vsyncpa [#allocation4], 1 }
 0x33b   :  { %712 = vsyncpa [#allocation4 + $0x1], 1 }
 0x33c   :  { %713 = vsyncpa [#allocation7], 1 }
 0x33d   :  { %714 = vsyncpa [#allocation5], 1 }
 0x33e   :  { %716 = vsyncpa [#allocation5 + $0x1], 1 }

</bundles_post_ra>
